<compile_context>
chip_gen: v5e
topology: v5e:2x2
jax: 0.10.0
libtpu: 0.0.40
codegen_flags: <defaults>
</compile_context>

<pallas_src>
import jax
import jax.numpy as jnp
import numpy as np
from jax import lax
from jax.experimental import pallas as pl
from jax.experimental.pallas import tpu as pltpu


def _basic_block_kernel(x_ref, w1_ref, w2_ref, b1_ref, b2_ref, out_ref):
    """Processes NB images per grid step.

    x_ref   : (NB, H, W*C)        f32   lane-dense input (also the residual)
    w1_ref  : (3*W*C,   W*Cout)   bf16  merged-K banded conv1 weights (BN1 scale folded)
    w2_ref  : (3*W*Cout, W*Cout)  bf16  merged-K banded conv2 weights (BN2 scale folded)
    b1_ref  : (1, W*Cout)         f32   lane-tiled BN1 bias
    b2_ref  : (1, W*Cout)         f32   lane-tiled BN2 bias
    out_ref : (NB, H, W*Cout)
    """
    NB, H, WC = x_ref.shape
    WCo = out_ref.shape[-1]

    x = x_ref[...]                                    # single f32 load; reused as residual
    zrow = jnp.zeros((NB, 1, WC), jnp.float32)

    def conv(act, w_ref):
        # act: (NB, H, WC) f32.  Build the merged-K LHS: the three H-shifted operands
        # (zero halo along H, per image) concatenated along the lane axis, then one
        # bf16 MXU matmul with f32 accumulation.
        up = jnp.concatenate([zrow, act[:, :H - 1, :]], axis=1)    # input row h-1
        down = jnp.concatenate([act[:, 1:, :], zrow], axis=1)      # input row h+1
        lhs = jnp.concatenate([up, act, down], axis=-1)            # (NB, H, 3*WC)
        lhs = lhs.reshape(NB * H, 3 * WC).astype(w_ref.dtype)
        return jnp.dot(lhs, w_ref[...], preferred_element_type=jnp.float32)

    # conv1 (+ folded bn1 scale) -> bn1 bias -> relu1
    h1 = jnp.maximum(conv(x, w1_ref) + b1_ref[...], 0.0)           # (NB*H, WCo) f32

    # conv2 (+ folded bn2 scale) -> bn2 bias -> residual add -> relu2 (epilogue in f32)
    acc2 = conv(h1.reshape(NB, H, WCo), w2_ref)
    out = jnp.maximum(acc2 + b2_ref[...] + x.reshape(NB * H, WCo), 0.0)
    out_ref[...] = out.reshape(NB, H, WCo).astype(out_ref.dtype)


def _banded_weights(w_hwio, scale, W):
    """Per-ky block-banded weight matrices, stacked along K: shape (3*W*Cin, W*Cout).

    band_ky[(w+dx)*Cin + ci, w*Cout + co] = w[ky, dx+1, ci, co] * scale[co]
    for dx in {-1, 0, 1} and 0 <= w+dx < W (zero padding along W handled implicitly).
    """
    wf = (w_hwio * scale).astype(jnp.float32)          # fold BN scale into output channels
    bands = []
    for ky in range(3):
        band = None
        for kx in range(3):
            dx = kx - 1
            shift = jnp.eye(W, W, k=-dx, dtype=jnp.float32)   # shift[i, j] = 1 iff i == j + dx
            blk = jnp.kron(shift, wf[ky, kx])                 # (W*Cin, W*Cout)
            band = blk if band is None else band + blk
        bands.append(band)
    return jnp.concatenate(bands, axis=0)              # merged-K: [band0; band1; band2]


def prepare_basic_block_params(w1_hwio, w2_hwio,
                               gamma1, beta1, mean1, var1,
                               gamma2, beta2, mean2, var2,
                               W, eps=1e-5, compute_dtype=jnp.bfloat16):
    """Parameter-only precompute (BN fold + banded weights). Call once; reuse per forward."""
    s1 = gamma1 / jnp.sqrt(var1 + eps)
    b1 = beta1 - mean1 * s1
    s2 = gamma2 / jnp.sqrt(var2 + eps)
    b2 = beta2 - mean2 * s2
    Cout = w1_hwio.shape[-1]
    w1cat = _banded_weights(w1_hwio, s1, W).astype(compute_dtype)   # (3*W*Cin, W*Cout)
    w2cat = _banded_weights(w2_hwio, s2, W).astype(compute_dtype)   # (3*W*Cout, W*Cout)
    b1t = jnp.tile(b1, W).reshape(1, W * Cout).astype(jnp.float32)  # lane-tiled biases
    b2t = jnp.tile(b2, W).reshape(1, W * Cout).astype(jnp.float32)
    return w1cat, w2cat, b1t, b2t


def basic_block_m(x_nchw, w1cat, w2cat, b1t, b2t, *, num_steps=1):
    """Forward pass of BasicBlockM (stride=1, downsample=None). Input/output NCHW.

    num_steps=1 puts the whole batch in one grid step (best for v5e/v6e single TC);
    num_steps=2 gives each v7x TensorCore a batch chunk (grid axis is 'parallel').
    """
    N, C, H, W = x_nchw.shape
    WC = W * C
    WCo = b1t.shape[-1]
    assert WC == WCo, "residual path requires inplanes == planes when downsample is None"
    assert N % num_steps == 0
    NB = N // num_steps

    # NHWC, then fuse (W, C) into one lane-dense axis (same memory layout, free reshape).
    x = jnp.transpose(x_nchw, (0, 2, 3, 1)).reshape(N, H, WC).astype(jnp.float32)

    out3d = pl.pallas_call(
        _basic_block_kernel,
        out_shape=jax.ShapeDtypeStruct((N, H, WCo), x_nchw.dtype),
        grid_spec=pltpu.PrefetchScalarGridSpec(
            num_scalar_prefetch=0,
            grid=(num_steps,),
            in_specs=[
                pl.BlockSpec((NB, H, WC), lambda s: (s, 0, 0)),
                pl.BlockSpec((3 * WC, WCo), lambda s: (0, 0)),
                pl.BlockSpec((3 * WCo, WCo), lambda s: (0, 0)),
                pl.BlockSpec((1, WCo), lambda s: (0, 0)),
                pl.BlockSpec((1, WCo), lambda s: (0, 0)),
            ],
            out_specs=pl.BlockSpec((NB, H, WCo), lambda s: (s, 0, 0)),
        ),
        compiler_params=pltpu.CompilerParams(
            dimension_semantics=("parallel",),
            vmem_limit_bytes=32 * 1024 * 1024,
        ),
    )(x, w1cat, w2cat, b1t, b2t)

    out = out3d.reshape(N, H, W, C)
    return jnp.transpose(out, (0, 3, 1, 2))            # back to NCHW


# ---------------------- pure-JAX f32 reference (for validation) ----------------------
def _conv3x3_ref(x_nhwc, w_hwio):
    return lax.conv_general_dilated(
        x_nhwc, w_hwio, window_strides=(1, 1), padding=((1, 1), (1, 1)),
        dimension_numbers=("NHWC", "HWIO", "NHWC"))


def _basic_block_ref(x_nchw, w1_hwio, w2_hwio, s1, b1, s2, b2):
    x = jnp.transpose(x_nchw, (0, 2, 3, 1))
    h = jnp.maximum(_conv3x3_ref(x, w1_hwio) * s1 + b1, 0.0)
    o = _conv3x3_ref(h, w2_hwio) * s2 + b2 + x
    o = jnp.maximum(o, 0.0)
    return jnp.transpose(o, (0, 3, 1, 2))


if __name__ == "__main__":
    # Small shapes consistent with the module: inplanes = planes = 8, stride = 1, W*C = 128.
    N, C, H, W = 2, 8, 16, 16
    planes = C
    eps = 1e-5

    key = jax.random.PRNGKey(0)
    kx, kw1, kw2 = jax.random.split(key, 3)

    x = jax.random.normal(kx, (N, C, H, W), jnp.float32)
    # conv weights in HWIO layout (3, 3, Cin, Cout)
    w1 = jax.random.normal(kw1, (3, 3, C, planes), jnp.float32) * 0.1
    w2 = jax.random.normal(kw2, (3, 3, planes, planes), jnp.float32) * 0.1

    # Deterministic BN params; running_mean = 0, running_var = 1 (fresh BatchNorm2d, eval).
    gamma1 = 1.0 + 0.10 * jnp.arange(planes, dtype=jnp.float32)
    beta1 = 0.01 * jnp.arange(planes, dtype=jnp.float32)
    gamma2 = 1.0 - 0.05 * jnp.arange(planes, dtype=jnp.float32)
    beta2 = -0.02 * jnp.arange(planes, dtype=jnp.float32)
    mean1 = jnp.zeros((planes,), jnp.float32)
    var1 = jnp.ones((planes,), jnp.float32)
    mean2 = jnp.zeros((planes,), jnp.float32)
    var2 = jnp.ones((planes,), jnp.float32)

    # Parameter precompute done once, outside the per-call forward path.
    w1cat, w2cat, b1t, b2t = prepare_basic_block_params(
        w1, w2, gamma1, beta1, mean1, var1, gamma2, beta2, mean2, var2, W=W, eps=eps)
    w1cat, w2cat, b1t, b2t = jax.block_until_ready((w1cat, w2cat, b1t, b2t))

    fwd = jax.jit(basic_block_m)
    out = jax.block_until_ready(fwd(x, w1cat, w2cat, b1t, b2t))

    # Reference in f32; bf16 matmul operands => ~1e-2 tolerance.
    s1 = gamma1 / jnp.sqrt(var1 + eps)
    b1 = beta1 - mean1 * s1
    s2 = gamma2 / jnp.sqrt(var2 + eps)
    b2 = beta2 - mean2 * s2
    ref = _basic_block_ref(x, w1, w2, s1, b1, s2, b2)
    np.testing.assert_allclose(np.asarray(out), np.asarray(ref), atol=2e-2, rtol=2e-2)

    print("KERNEL_OK")
</pallas_src>

<mosaic_0001>
module attributes {stable_mosaic.version = 11 : i64} {
  func.func @_basic_block_kernel(%arg0: i32, %arg1: memref<2x16x128xf32, #tpu.memory_space<vmem>>, %arg2: memref<384x128xbf16, #tpu.memory_space<vmem>>, %arg3: memref<384x128xbf16, #tpu.memory_space<vmem>>, %arg4: memref<1x128xf32, #tpu.memory_space<vmem>>, %arg5: memref<1x128xf32, #tpu.memory_space<vmem>>, %arg6: memref<2x16x128xf32, #tpu.memory_space<vmem>>) attributes {dimension_semantics = [#tpu.dimension_semantics<parallel>], iteration_bounds = array<i64: 1>, scalar_prefetch = 0 : i64, scratch_operands = 0 : i64, tpu.core_type = #tpu.core_type<tc>, window_params = [{transform_indices = @transform_0, window_bounds = array<i64: 2, 16, 128>}, {pipeline_mode = #tpu.pipeline_mode<synchronous>, transform_indices = @transform_1, window_bounds = array<i64: 384, 128>}, {pipeline_mode = #tpu.pipeline_mode<synchronous>, transform_indices = @transform_2, window_bounds = array<i64: 384, 128>}, {pipeline_mode = #tpu.pipeline_mode<synchronous>, transform_indices = @transform_3, window_bounds = array<i64: 1, 128>}, {pipeline_mode = #tpu.pipeline_mode<synchronous>, transform_indices = @transform_4, window_bounds = array<i64: 1, 128>}, {transform_indices = @transform_5, window_bounds = array<i64: 2, 16, 128>}]} {
    %c0 = arith.constant 0 : index
    %c0_0 = arith.constant 0 : index
    %c0_1 = arith.constant 0 : index
    %0 = vector.load %arg1[%c0, %c0_0, %c0_1] : memref<2x16x128xf32, #tpu.memory_space<vmem>>, vector<2x16x128xf32>
    %cst = arith.constant 0.000000e+00 : f32
    %1 = vector.broadcast %cst : f32 to vector<2x1x128xf32>
    %2 = vector.extract_strided_slice %0 {offsets = [0, 0, 0], sizes = [2, 15, 128], strides = [1, 1, 1]} : vector<2x16x128xf32> to vector<2x15x128xf32>
    %3 = tpu.concatenate %1, %2 in 1 : vector<2x1x128xf32>, vector<2x15x128xf32> -> vector<2x16x128xf32>
    %4 = vector.extract_strided_slice %0 {offsets = [0, 1, 0], sizes = [2, 15, 128], strides = [1, 1, 1]} : vector<2x16x128xf32> to vector<2x15x128xf32>
    %5 = tpu.concatenate %4, %1 in 1 : vector<2x15x128xf32>, vector<2x1x128xf32> -> vector<2x16x128xf32>
    %6 = tpu.concatenate %3, %0, %5 in 2 : vector<2x16x128xf32>, vector<2x16x128xf32>, vector<2x16x128xf32> -> vector<2x16x384xf32>
    %7 = vector.shape_cast %6 : vector<2x16x384xf32> to vector<32x384xf32>
    %8 = arith.truncf %7 : vector<32x384xf32> to vector<32x384xbf16>
    %c0_2 = arith.constant 0 : index
    %c0_3 = arith.constant 0 : index
    %9 = vector.load %arg2[%c0_2, %c0_3] : memref<384x128xbf16, #tpu.memory_space<vmem>>, vector<384x128xbf16>
    %cst_4 = arith.constant dense<0.000000e+00> : vector<32x128xf32>
    %10 = tpu.matmul %8, %9, %cst_4 {dimension_numbers = #tpu.dot_dimension_numbers<[1], [0], [0], [1], [0, 0, 1, 1], [], []>} : vector<32x384xbf16>, vector<384x128xbf16>, vector<32x128xf32> -> vector<32x128xf32>
    %c0_5 = arith.constant 0 : index
    %c0_6 = arith.constant 0 : index
    %11 = vector.load %arg4[%c0_5, %c0_6] : memref<1x128xf32, #tpu.memory_space<vmem>>, vector<1x128xf32>
    %12 = vector.broadcast %11 : vector<1x128xf32> to vector<32x128xf32>
    %13 = arith.addf %10, %12 : vector<32x128xf32>
    %cst_7 = arith.constant 0.000000e+00 : f32
    %14 = vector.broadcast %cst_7 : f32 to vector<32x128xf32>
    %15 = arith.maximumf %13, %14 : vector<32x128xf32>
    %16 = vector.shape_cast %15 : vector<32x128xf32> to vector<2x16x128xf32>
    %17 = vector.extract_strided_slice %16 {offsets = [0, 0, 0], sizes = [2, 15, 128], strides = [1, 1, 1]} : vector<2x16x128xf32> to vector<2x15x128xf32>
    %18 = tpu.concatenate %1, %17 in 1 : vector<2x1x128xf32>, vector<2x15x128xf32> -> vector<2x16x128xf32>
    %19 = vector.extract_strided_slice %16 {offsets = [0, 1, 0], sizes = [2, 15, 128], strides = [1, 1, 1]} : vector<2x16x128xf32> to vector<2x15x128xf32>
    %20 = tpu.concatenate %19, %1 in 1 : vector<2x15x128xf32>, vector<2x1x128xf32> -> vector<2x16x128xf32>
    %21 = tpu.concatenate %18, %16, %20 in 2 : vector<2x16x128xf32>, vector<2x16x128xf32>, vector<2x16x128xf32> -> vector<2x16x384xf32>
    %22 = vector.shape_cast %21 : vector<2x16x384xf32> to vector<32x384xf32>
    %23 = arith.truncf %22 : vector<32x384xf32> to vector<32x384xbf16>
    %c0_8 = arith.constant 0 : index
    %c0_9 = arith.constant 0 : index
    %24 = vector.load %arg3[%c0_8, %c0_9] : memref<384x128xbf16, #tpu.memory_space<vmem>>, vector<384x128xbf16>
    %cst_10 = arith.constant dense<0.000000e+00> : vector<32x128xf32>
    %25 = tpu.matmul %23, %24, %cst_10 {dimension_numbers = #tpu.dot_dimension_numbers<[1], [0], [0], [1], [0, 0, 1, 1], [], []>} : vector<32x384xbf16>, vector<384x128xbf16>, vector<32x128xf32> -> vector<32x128xf32>
    %c0_11 = arith.constant 0 : index
    %c0_12 = arith.constant 0 : index
    %26 = vector.load %arg5[%c0_11, %c0_12] : memref<1x128xf32, #tpu.memory_space<vmem>>, vector<1x128xf32>
    %27 = vector.broadcast %26 : vector<1x128xf32> to vector<32x128xf32>
    %28 = arith.addf %25, %27 : vector<32x128xf32>
    %29 = vector.shape_cast %0 : vector<2x16x128xf32> to vector<32x128xf32>
    %30 = arith.addf %28, %29 : vector<32x128xf32>
    %cst_13 = arith.constant 0.000000e+00 : f32
    %31 = vector.broadcast %cst_13 : f32 to vector<32x128xf32>
    %32 = arith.maximumf %30, %31 : vector<32x128xf32>
    %33 = vector.shape_cast %32 : vector<32x128xf32> to vector<2x16x128xf32>
    %c0_14 = arith.constant 0 : index
    %c0_15 = arith.constant 0 : index
    %c0_16 = arith.constant 0 : index
    %34 = vector.load %arg6[%c0_14, %c0_15, %c0_16] : memref<2x16x128xf32, #tpu.memory_space<vmem>>, vector<2x16x128xf32>
    tpu.vector_store %arg6[%c0_14, %c0_15, %c0_16], %33 {strides = array<i32>} : memref<2x16x128xf32, #tpu.memory_space<vmem>>, vector<2x16x128xf32>,
    return
  }
  func.func @transform_0(%arg0: i32) -> (i32, i32, i32) {
    %c0_i32 = arith.constant 0 : i32
    %c0_i32_0 = arith.constant 0 : i32
    %c0_i32_1 = arith.constant 0 : i32
    return %arg0, %c0_i32, %c0_i32_0 : i32, i32, i32
  }
  func.func @transform_1(%arg0: i32) -> (i32, i32) {
    %c0_i32 = arith.constant 0 : i32
    %c0_i32_0 = arith.constant 0 : i32
    %c0_i32_1 = arith.constant 0 : i32
    return %c0_i32, %c0_i32_0 : i32, i32
  }
  func.func @transform_2(%arg0: i32) -> (i32, i32) {
    %c0_i32 = arith.constant 0 : i32
    %c0_i32_0 = arith.constant 0 : i32
    %c0_i32_1 = arith.constant 0 : i32
    return %c0_i32, %c0_i32_0 : i32, i32
  }
  func.func @transform_3(%arg0: i32) -> (i32, i32) {
    %c0_i32 = arith.constant 0 : i32
    %c0_i32_0 = arith.constant 0 : i32
    %c0_i32_1 = arith.constant 0 : i32
    return %c0_i32, %c0_i32_0 : i32, i32
  }
  func.func @transform_4(%arg0: i32) -> (i32, i32) {
    %c0_i32 = arith.constant 0 : i32
    %c0_i32_0 = arith.constant 0 : i32
    %c0_i32_1 = arith.constant 0 : i32
    return %c0_i32, %c0_i32_0 : i32, i32
  }
  func.func @transform_5(%arg0: i32) -> (i32, i32, i32) {
    %c0_i32 = arith.constant 0 : i32
    %c0_i32_0 = arith.constant 0 : i32
    %c0_i32_1 = arith.constant 0 : i32
    return %arg0, %c0_i32, %c0_i32_0 : i32, i32, i32
  }
}

</mosaic_0001>

<bundles_post_ra>
// kernel: basic_block_m.1
= control target key start
LH: loop header
LB: loop body
LE: loop exit
PB: predicated region body
PF: predicated region fallthrough
CT: control target
= control target key end

     0   :  { %vm28_vm0 = vcmask 1040384   ;;  %vm41_vm1 = vcmask 1046528   ;;  %vm907_vm3 = vmmov 1   ;;  %s1178_s1 = inlined_call_operand.vmem [shape: bf16[384,128], index: 1, kind: input, shape index: {}]   ;;  %s1179_s3 = inlined_call_operand.vmem [shape: f32[1,128], index: 3, kind: input, shape index: {}]   ;;  %s1180_s0 = inlined_call_operand.vmem [shape: f32[2,16,128], index: 0, kind: input, shape index: {}]   ;;  %s1181_s2 = inlined_call_operand.vmem [shape: bf16[384,128], index: 2, kind: input, shape index: {}]   ;;  %s1182_s4 = inlined_call_operand.vmem [shape: f32[1,128], index: 4, kind: input, shape index: {}]   ;;  %s1183_s5 = inlined_call_operand.vmem [shape: f32[2,16,128], index: 5, kind: output, shape index: {}]  }
   0x1   :  { %v847_v0 = vld [vmem:[%s1178_s1 + $0x38] sm:$0xff]  ;;  %v846_v3 = vld [vmem:[%s1178_s1 + $0x30] sm:$0xff]  ;;  %v845_v6 = vld [vmem:[%s1178_s1 + $0x28] sm:$0xff] }
   0x2   :  { %v855_v1 = vld [vmem:[%s1178_s1 + $0x78] sm:$0xff]  ;;  %256 = vmatpush.bf16.msra.mxu0 %v847_v0  ;;  %v854_v4 = vld [vmem:[%s1178_s1 + $0x70] sm:$0xff]  ;;  %v853_v7 = vld [vmem:[%s1178_s1 + $0x68] sm:$0xff] }
   0x3   :  { %v863_v2 = vld [vmem:[%s1178_s1 + $0xb8] sm:$0xff]  ;;  %275 = vmatpush.bf16.msra.mxu1 %v855_v1  ;;  %v862_v5 = vld [vmem:[%s1178_s1 + $0xb0] sm:$0xff]  ;;  %v861_v8 = vld [vmem:[%s1178_s1 + $0xa8] sm:$0xff] }
   0x4   :  { %294 = vmatpush.bf16.msra.mxu2 %v863_v2  ;;  %v844_v9 = vld [vmem:[%s1178_s1 + $0x20] sm:$0xff]  ;;  %v843_v12 = vld [vmem:[%s1178_s1 + $0x18] sm:$0xff]  ;;  %v842_v15 = vld [vmem:[%s1178_s1 + $0x10] sm:$0xff] }
   0x5   :  { %v852_v10 = vld [vmem:[%s1178_s1 + $0x60] sm:$0xff]  ;;  %v851_v13 = vld [vmem:[%s1178_s1 + $0x58] sm:$0xff]  ;;  %v850_v16 = vld [vmem:[%s1178_s1 + $0x50] sm:$0xff] }
   0x6   :  { %257 = vmatpush.bf16.msra.mxu0 %v846_v3  ;;  %v860_v11 = vld [vmem:[%s1178_s1 + $0xa0] sm:$0xff]  ;;  %v859_v14 = vld [vmem:[%s1178_s1 + $0x98] sm:$0xff]  ;;  %v858_v18 = vld [vmem:[%s1178_s1 + $0x90] sm:$0xff] }
   0x7   :  { %276 = vmatpush.bf16.msra.mxu1 %v854_v4  ;;  %v871_v17 = vld [vmem:[%s1181_s2 + $0x38] sm:$0xff]  ;;  %v998_v19 = vld [vmem:[%s1180_s0] sm:$0xff]  ;;  %v1003_v20 = vld [vmem:[%s1180_s0 + $0x8] sm:$0xff] }
   0x8   :  { %295 = vmatpush.bf16.msra.mxu2 %v862_v5  ;;  %547 = vmatpush.bf16.msra.mxu3 %v871_v17  ;;  %v870_v21 = vld [vmem:[%s1181_s2 + $0x30] sm:$0xff]  ;;  %v841_v22 = vld [vmem:[%s1178_s1 + $0x8] sm:$0xff]  ;;  %v29_v24 = vrot.slane %v998_v19, 7  ;;  %v30_v25 = vrot.slane %v1003_v20, 7  ;;  %v42_v27 = vrot.slane %v998_v19, 1  ;;  %v43_v28 = vrot.slane %v1003_v20, 1  ;;  %vm716_vm2 = vmneg %vm28_vm0 }
   0x9   :  { %v849_v23 = vld [vmem:[%s1178_s1 + $0x48] sm:$0xff]  ;;  %v840_v29 = vld [vmem:[%s1178_s1] sm:$0xff]  ;;  %v879_v34 = vld [vmem:[%s1181_s2 + $0x78] sm:$0xff]  ;;  %v55_v37 = vpack.c.bf16 %v1003_v20, %v998_v19 }
   0xa   :  { %258 = vmatpush.bf16.msra.mxu0 %v845_v6  ;;  %v857_v26 = vld [vmem:[%s1178_s1 + $0x88] sm:$0xff]  ;;  %v848_v30 = vld [vmem:[%s1178_s1 + $0x40] sm:$0xff]  ;;  %v31_v31 = vsel %vm28_vm0, %v29_v24, %v30_v25  ;;  %v44_v33 = vsel %vm41_vm1, %v42_v27, %v43_v28  ;;  %v1039_v35 = vld [vmem:[%s1181_s2 + $0xb8] sm:$0xff] }
   0xb   :  { %277 = vmatpush.bf16.msra.mxu1 %v853_v7  ;;  %v856_v32 = vld [vmem:[%s1178_s1 + $0x80] sm:$0xff]  ;;  %v718_v36 = vpack.c.bf16 %v31_v31, %v29_v24  ;;  %vm1043_vm4 = vmpackc.low %vm907_vm3, %vm716_vm2  ;;  %v725_v39 = vpack.c.bf16 %v43_v28, %v44_v33  ;;  %v878_v41 = vld [vmem:[%s1181_s2 + $0x70] sm:$0xff] }
   0xc   :  { %296 = vmatpush.bf16.msra.mxu2 %v861_v8  ;;  %548 = vmatpush.bf16.msra.mxu3 %v870_v21  ;;  %vm1048_vm5 = vmpackc.low %vm41_vm1, %vm907_vm3  ;;  %v1059_v42 = vld [vmem:[%s1181_s2 + $0xb0] sm:$0xff]  ;;  %v1073_v44 = vld [vmem:[%s1180_s0 + $0x18] sm:$0xff] }
   0xd   :  { %v1068_v43 = vld [vmem:[%s1180_s0 + $0x10] sm:$0xff]  ;;  %v877_v45 = vld [vmem:[%s1181_s2 + $0x68] sm:$0xff]  ;;  %v33_v47 = vrot.slane %v1073_v44, 7  ;;  %v46_v49 = vrot.slane %v1073_v44, 1  ;;  %v876_v57 = vld [vmem:[%s1181_s2 + $0x60] sm:$0xff] }
   0xe   :  { %259 = vmatpush.bf16.msra.mxu0 %v844_v9  ;;  %v32_v46 = vrot.slane %v1068_v43, 7  ;;  %v45_v48 = vrot.slane %v1068_v43, 1  ;;  %v58_v53 = vpack.c.bf16 %v1073_v44, %v1068_v43  ;;  %v869_v55 = vld [vmem:[%s1181_s2 + $0x28] sm:$0xff]  ;;  %v868_v58 = vld [vmem:[%s1181_s2 + $0x20] sm:$0xff]  ;;  %v875_v60 = vld [vmem:[%s1181_s2 + $0x58] sm:$0xff] }
   0xf   :  { %278 = vmatpush.bf16.msra.mxu1 %v852_v10  ;;  %v885_v56 = vld [vmem:[%s1181_s2 + $0xa8] sm:$0xff]  ;;  %v884_v59 = vld [vmem:[%s1181_s2 + $0xa0] sm:$0xff]  ;;  %v867_v61 = vld [vmem:[%s1181_s2 + $0x18] sm:$0xff] }
  0x10   :  { %297 = vmatpush.bf16.msra.mxu2 %v860_v11  ;;  %v34_v50 = vsel %vm28_vm0, %v32_v46, %v33_v47  ;;  %v47_v51 = vsel %vm41_vm1, %v45_v48, %v46_v49  ;;  %549 = vmatpush.bf16.msra.mxu3 %v869_v55  ;;  %v883_v62 = vld [vmem:[%s1181_s2 + $0x98] sm:$0xff]  ;;  %v874_v63 = vld [vmem:[%s1181_s2 + $0x50] sm:$0xff]  ;;  %v873_v2 = vld [vmem:[%s1181_s2 + $0x48] sm:$0xff] }
  0x11   :  { %v722_v52 = vpack.c.bf16 %v34_v50, %v32_v46  ;;  %v728_v54 = vpack.c.bf16 %v46_v49, %v47_v51  ;;  %v866_v0 = vld [vmem:[%s1181_s2 + $0x10] sm:$0xff]  ;;  %v865_v3 = vld [vmem:[%s1181_s2 + $0x8] sm:$0xff]  ;;  %v872_v5 = vld [vmem:[%s1181_s2 + $0x40] sm:$0xff] }
  0x12   :  { %260 = vmatpush.bf16.msra.mxu0 %v843_v12  ;;  %v882_v1 = vld [vmem:[%s1181_s2 + $0x90] sm:$0xff]  ;;  %v881_v4 = vld [vmem:[%s1181_s2 + $0x88] sm:$0xff]  ;;  %v864_v6 = vld [vmem:[%s1181_s2] sm:$0xff] }
  0x13   :  { %279 = vmatpush.bf16.msra.mxu1 %v851_v13  ;;  %v880_v7 = vld [vmem:[%s1181_s2 + $0x80] sm:$0xff] }
  0x14   :  { %298 = vmatpush.bf16.msra.mxu2 %v859_v14  ;;  %550 = vmatpush.bf16.msra.mxu3 %v868_v58  ;;  %v905_v8 = vld [vmem:[%s1179_s3] ss:$0 sm:$0xff] }
  0x16   :  { %261 = vmatpush.bf16.msra.mxu0 %v842_v15 }
  0x17   :  { %280 = vmatpush.bf16.msra.mxu1 %v850_v16 }
  0x18   :  { %299 = vmatpush.bf16.msra.mxu2 %v858_v18  ;;  %551 = vmatpush.bf16.msra.mxu3 %v867_v61  ;;  %v906_v61 = vld [vmem:[%s1182_s4] ss:$0 sm:$0xff] }
  0x1a   :  { %262 = vmatpush.bf16.msra.mxu0 %v841_v22 }
  0x1b   :  { %281 = vmatpush.bf16.msra.mxu1 %v849_v23 }
  0x1c   :  { %300 = vmatpush.bf16.msra.mxu2 %v857_v26  ;;  %552 = vmatpush.bf16.msra.mxu3 %v866_v0 }
  0x1e   :  { %263 = vmatpush.bf16.msra.mxu0 %v840_v29 }
  0x1f   :  { %282 = vmatpush.bf16.msra.mxu1 %v848_v30 }
  0x20   :  { %301 = vmatpush.bf16.msra.mxu2 %v856_v32  ;;  %553 = vmatpush.bf16.msra.mxu3 %v865_v3 }
  0x21   :  { %719 = vmatmul.msk.bf16.vlgmr.msra.gmra.mxu0 %vm1043_vm4, %v718_v36 }
  0x22   :  { %566 = vmatpush.bf16.msrb.mxu0 %v879_v34  ;;  %283 = vmatmul.bf16.vlgmr.msra.gmra.mxu1 %v55_v37 }
  0x23   :  { %585 = vmatpush.bf16.msrb.mxu1 %v1039_v35  ;;  %726 = vmatmul.msk.bf16.vlgmr.msra.gmra.mxu2 %vm1048_vm5, %v725_v39 }
  0x24   :  { %888 = vmatpush.bf16.msrb.mxu2 %v879_v34  ;;  %554 = vmatpush.bf16.msra.mxu3 %v864_v6 }
  0x26   :  { %567 = vmatpush.bf16.msrb.mxu0 %v878_v41 }
  0x27   :  { %586 = vmatpush.bf16.msrb.mxu1 %v1059_v42 }
  0x28   :  { %889 = vmatpush.bf16.msrb.mxu2 %v878_v41  ;;  %896 = vmatpush.bf16.msrb.mxu3 %v1039_v35 }
  0x2a   :  { %568 = vmatpush.bf16.msrb.mxu0 %v877_v45 }
  0x2b   :  { %587 = vmatpush.bf16.msrb.mxu1 %v885_v56 }
  0x2c   :  { %890 = vmatpush.bf16.msrb.mxu2 %v877_v45  ;;  %897 = vmatpush.bf16.msrb.mxu3 %v1059_v42 }
  0x2e   :  { %569 = vmatpush.bf16.msrb.mxu0 %v876_v57 }
  0x2f   :  { %588 = vmatpush.bf16.msrb.mxu1 %v884_v59 }
  0x30   :  { %891 = vmatpush.bf16.msrb.mxu2 %v876_v57  ;;  %898 = vmatpush.bf16.msrb.mxu3 %v885_v56 }
  0x31   :  { %723 = vmatmul.msk.bf16.gmra.mxu0 %vm1043_vm4, %v722_v52 }
  0x32   :  { %288 = vmatmul.bf16.gmra.mxu1 %v58_v53  ;;  %570 = vmatpush.bf16.msrb.mxu0 %v875_v60 }
  0x33   :  { %729 = vmatmul.msk.bf16.gmra.mxu2 %vm1048_vm5, %v728_v54  ;;  %589 = vmatpush.bf16.msrb.mxu1 %v883_v62 }
  0x34   :  { %892 = vmatpush.bf16.msrb.mxu2 %v875_v60  ;;  %899 = vmatpush.bf16.msrb.mxu3 %v884_v59 }
  0x36   :  { %571 = vmatpush.bf16.msrb.mxu0 %v874_v63 }
  0x37   :  { %590 = vmatpush.bf16.msrb.mxu1 %v882_v1 }
  0x38   :  { %893 = vmatpush.bf16.msrb.mxu2 %v874_v63  ;;  %900 = vmatpush.bf16.msrb.mxu3 %v883_v62 }
  0x3a   :  { %572 = vmatpush.bf16.msrb.mxu0 %v873_v2 }
  0x3b   :  { %591 = vmatpush.bf16.msrb.mxu1 %v881_v4 }
  0x3c   :  { %894 = vmatpush.bf16.msrb.mxu2 %v873_v2  ;;  %901 = vmatpush.bf16.msrb.mxu3 %v882_v1 }
  0x3e   :  { %573 = vmatpush.bf16.msrb.mxu0 %v872_v5 }
  0x3f   :  { %592 = vmatpush.bf16.msrb.mxu1 %v880_v7 }
  0x40   :  { %895 = vmatpush.bf16.msrb.mxu2 %v872_v5  ;;  %902 = vmatpush.bf16.msrb.mxu3 %v881_v4 }
  0x44   :  { %903 = vmatpush.bf16.msrb.mxu3 %v880_v7 }
  0x9e   :  { %v265_v9 = vpop.f32.mrf.mxu0 }
  0x9f   :  { %v284_v10 = vpop.f32.mrf.mxu1  ;;  %v266_v11 = vadd.f32 %v905_v8, %v265_v9 }
  0xa1   :  { %v285_v12 = vadd.f32 %v284_v10, %v266_v11 }
  0xa6   :  { %v303_v13 = vpop.f32.mrf.mxu2  ;;  %v267_v14 = vpop.f32.mrf.mxu0 }
  0xa7   :  { %v286_v15 = vpop.f32.mrf.mxu1  ;;  %v268_v16 = vadd.f32 %v905_v8, %v267_v14  ;;  %v304_v17 = vadd.f32 %v303_v13, %v285_v12 }
  0xa9   :  { %v287_v18 = vadd.f32 %v286_v15, %v268_v16  ;;  %v313_v21 = vmax.f32 %v304_v17, 0.0 }
  0xab   :  { %v321_v26 = vrot.slane %v313_v21, 7  ;;  %v333_v27 = vrot.slane %v313_v21, 1 }
  0xae   :  { %v305_v22 = vpop.f32.mrf.mxu2  ;;  %v270_v24 = vpop.f32.mrf.mxu0 }
  0xaf   :  { %v306_v23 = vadd.f32 %v305_v22, %v287_v18  ;;  %v289_v28 = vpop.f32.mrf.mxu1  ;;  %v271_v31 = vadd.f32 %v905_v8, %v270_v24 }
  0xb1   :  { %v314_v25 = vmax.f32 %v306_v23, 0.0  ;;  %v290_v39 = vadd.f32 %v289_v28, %v271_v31 }
  0xb3   :  { %v322_v29 = vrot.slane %v314_v25, 7  ;;  %v334_v30 = vrot.slane %v314_v25, 1  ;;  %v346_v32 = vpack.c.bf16 %v314_v25, %v313_v21 }
  0xb5   :  { %574 = vmatmul.bf16.vlgmr.msrb.gmra.mxu0 %v346_v32  ;;  %v323_v33 = vsel %vm28_vm0, %v321_v26, %v322_v29  ;;  %v335_v34 = vsel %vm41_vm1, %v333_v27, %v334_v30 }
  0xb6   :  { %v308_v35 = vpop.f32.mrf.mxu2  ;;  %v828_v36 = vpack.c.bf16 %v323_v33, %v321_v26  ;;  %v835_v37 = vpack.c.bf16 %v334_v30, %v335_v34  ;;  %v272_v41 = vpop.f32.mrf.mxu0 }
  0xb7   :  { %v273_v42 = vadd.f32 %v905_v8, %v272_v41  ;;  %v309_v45 = vadd.f32 %v308_v35, %v290_v39  ;;  %v291_v46 = vpop.f32.mrf.mxu1 }
  0xb8   :  { %829 = vmatmul.msk.bf16.vlgmr.msra.gmra.mxu3 %vm1043_vm4, %v828_v36  ;;  %836 = vmatmul.msk.bf16.vlgmr.msrb.gmra.mxu1 %vm1048_vm5, %v835_v37 }
  0xb9   :  { %v292_v47 = vadd.f32 %v291_v46, %v273_v42  ;;  %v315_v49 = vmax.f32 %v309_v45, 0.0 }
  0xbb   :  { %v324_v52 = vrot.slane %v315_v49, 7  ;;  %v336_v58 = vrot.slane %v315_v49, 1 }
  0xbe   :  { %v310_v48 = vpop.f32.mrf.mxu2 }
  0xbf   :  { %v311_v50 = vadd.f32 %v310_v48, %v292_v47 }
  0xc1   :  { %v316_v51 = vmax.f32 %v311_v50, 0.0 }
  0xc3   :  { %v325_v53 = vrot.slane %v316_v51, 7  ;;  %v349_v54 = vpack.c.bf16 %v316_v51, %v315_v49  ;;  %v337_v57 = vrot.slane %v316_v51, 1 }
  0xc5   :  { %579 = vmatmul.bf16.vlgmr.msrb.gmra.mxu2 %v349_v54  ;;  %v326_v55 = vsel %vm28_vm0, %v324_v52, %v325_v53  ;;  %v338_v59 = vsel %vm41_vm1, %v336_v58, %v337_v57 }
  0xc6   :  { %v832_v56 = vpack.c.bf16 %v326_v55, %v324_v52  ;;  %v838_v60 = vpack.c.bf16 %v337_v57, %v338_v59 }
  0xc8   :  { %833 = vmatmul.msk.bf16.gmra.mxu3 %vm1043_vm4, %v832_v56 }
  0xd8   :  { %839 = vmatmul.msk.bf16.vlgmr.msrb.gmra.mxu3 %vm1048_vm5, %v838_v60 }
 0x132   :  { %v575_v62 = vpop.f32.mrf.mxu0 }
 0x135   :  { %v594_v1 = vpop.f32.mrf.mxu1 }
 0x13a   :  { %v577_v7 = vpop.f32.mrf.mxu0 }
 0x13b   :  { %v556_v63 = vpop.f32.mrf.mxu3 }
 0x13c   :  { %v557_v0 = vadd.f32 %v906_v61, %v556_v63 }
 0x13d   :  { %v596_v8 = vpop.f32.mrf.mxu1 }
 0x13e   :  { %v576_v2 = vadd.f32 %v575_v62, %v557_v0 }
 0x140   :  { %v595_v3 = vadd.f32 %v594_v1, %v576_v2 }
 0x142   :  { %v604_v38 = vadd.f32 %v595_v3, %v998_v19 }
 0x143   :  { %v558_v4 = vpop.f32.mrf.mxu3 }
 0x144   :  { %v608_v5 = vmax.f32 %v604_v38, 0.0  ;;  %v559_v6 = vadd.f32 %v906_v61, %v558_v4 }
 0x146   :  { %612 = vst [vmem:[%s1183_s5] sm:$0xff] %v608_v5  ;;  %v578_v40 = vadd.f32 %v577_v7, %v559_v6 }
 0x148   :  { %v597_v9 = vadd.f32 %v596_v8, %v578_v40  ;;  %v580_v14 = vpop.f32.mrf.mxu2 }
 0x14a   :  { %v605_v10 = vadd.f32 %v597_v9, %v1003_v20 }
 0x14b   :  { %v561_v11 = vpop.f32.mrf.mxu3 }
 0x14c   :  { %v609_v12 = vmax.f32 %v605_v10, 0.0  ;;  %v562_v13 = vadd.f32 %v906_v61, %v561_v11 }
 0x14e   :  { %613 = vst [vmem:[%s1183_s5 + $0x8] sm:$0xff] %v609_v12  ;;  %v581_v15 = vadd.f32 %v580_v14, %v562_v13 }
 0x150   :  { %v582_v23 = vpop.f32.mrf.mxu2 }
 0x153   :  { %v563_v19 = vpop.f32.mrf.mxu3 }
 0x154   :  { %v564_v18 = vadd.f32 %v906_v61, %v563_v19 }
 0x156   :  { %v583_v20 = vadd.f32 %v582_v23, %v564_v18 }
 0x15b   :  { %v599_v16 = vpop.f32.mrf.mxu3 }
 0x15c   :  { %v600_v17 = vadd.f32 %v599_v16, %v581_v15 }
 0x15e   :  { %v606_v21 = vadd.f32 %v600_v17, %v1068_v43 }
 0x160   :  { %v610_v22 = vmax.f32 %v606_v21, 0.0 }
 0x162   :  { %614 = vst [vmem:[%s1183_s5 + $0x10] sm:$0xff] %v610_v22 }
 0x163   :  { %v601_v24 = vpop.f32.mrf.mxu3 }
 0x164   :  { %v602_v25 = vadd.f32 %v601_v24, %v583_v20 }
 0x166   :  { %v607_v26 = vadd.f32 %v602_v25, %v1073_v44 }
 0x168   :  { %v611_v27 = vmax.f32 %v607_v26, 0.0 }
 0x16a   :  { %615 = vst [vmem:[%s1183_s5 + $0x18] sm:$0xff] %v611_v27 }

</bundles_post_ra>
